<compile_context>
chip_gen: v5e
topology: v5e:2x2
jax: 0.10.0
libtpu: 0.0.40
codegen_flags: <defaults>
</compile_context>

<pallas_src>
import jax
import jax.numpy as jnp
from jax.experimental import pallas as pl
from jax.experimental.pallas import tpu as pltpu


def _copy_kernel(x_ref, o_ref):
    # Pure pass-through: one full-width VMEM load + one full-width VMEM store.
    o_ref[...] = x_ref[...]


def identity_pallas(x):
    """Lane-dense identity copy of an NCHW tensor through a Pallas TPU kernel.

    Not on the Net.forward hot path (the reference forward is empty); used only
    by the self-test below to prove the Pallas plumbing compiles and runs.
    """
    n, c, h, w = x.shape
    rows, cols = n * c, h * w            # lane axis = H*W  -> lane-dense layout
    x2d = x.reshape(rows, cols)

    # Generation-aware tiling: keep each tile <= ~4 MiB so the double-buffered
    # (in + out) footprint fits comfortably in v7x's 64 MiB VMEM while staying
    # large enough to amortize the ~0.35 us per-grid-step overhead on v5e/v6e.
    itemsize = x2d.dtype.itemsize
    max_tile_bytes = 4 * 1024 * 1024
    block_rows = rows
    if rows * cols * itemsize > max_tile_bytes and rows % 8 == 0:
        cap = max(8, (max_tile_bytes // (cols * itemsize)) // 8 * 8)
        block_rows = 8
        cand = 8
        while cand <= min(cap, rows):
            if rows % cand == 0:
                block_rows = cand
            cand += 8

    grid = (rows // block_rows,)

    # NOTE: for a persistent-copy use case one would also pass
    # input_output_aliases={0: 0} to avoid writing a second HBM buffer; omitted
    # here so the self-test can safely compare the output against the input.
    out2d = pl.pallas_call(
        _copy_kernel,
        out_shape=jax.ShapeDtypeStruct(x2d.shape, x2d.dtype),
        grid=grid,
        in_specs=[pl.BlockSpec((block_rows, cols), lambda i: (i, 0))],
        out_specs=pl.BlockSpec((block_rows, cols), lambda i: (i, 0)),
        compiler_params=pltpu.CompilerParams(
            dimension_semantics=("parallel",),
        ),
    )(x2d)
    return out2d.reshape(n, c, h, w)


class Net:
    """JAX mirror of the (empty) PyTorch Net module."""

    def __init__(self, num_classes: int):
        # Reference __init__ creates no parameters.
        self.num_classes = num_classes

    def forward(self, x):
        # Faithful to the reference: forward body is `pass` -> returns None.
        # No kernel launch, no host sync: zero device work on the hot path.
        return None

    __call__ = forward


if __name__ == "__main__":
    key = jax.random.PRNGKey(0)
    # Small NCHW input consistent with a conv-style net: batch=2, channels=4, 16x16.
    x = jax.random.normal(key, (2, 4, 16, 16), dtype=jnp.float32)

    # Exercise the Pallas kernel once (off the module's hot path) and verify it
    # is an exact pass-through.
    y = identity_pallas(x)
    jax.block_until_ready(y)
    assert y.shape == x.shape and y.dtype == x.dtype
    assert bool(jnp.all(y == x))

    # Run the module wrapper: mirrors PyTorch semantics exactly (returns None),
    # with no device work and no blocking sync inside forward.
    net = Net(num_classes=10)
    out = net(x)
    assert out is None

    print("KERNEL_OK")
</pallas_src>

<mosaic_0001>
module attributes {stable_mosaic.version = 11 : i64} {
  func.func @_copy_kernel(%arg0: i32, %arg1: memref<8x256xf32, #tpu.memory_space<vmem>>, %arg2: memref<8x256xf32, #tpu.memory_space<vmem>>) attributes {dimension_semantics = [#tpu.dimension_semantics<parallel>], iteration_bounds = array<i64: 1>, scalar_prefetch = 0 : i64, scratch_operands = 0 : i64, tpu.core_type = #tpu.core_type<tc>, window_params = [{transform_indices = @transform_0, window_bounds = array<i64: 8, 256>}, {transform_indices = @transform_1, window_bounds = array<i64: 8, 256>}]} {
    %c0 = arith.constant 0 : index
    %c0_0 = arith.constant 0 : index
    %0 = vector.load %arg1[%c0, %c0_0] : memref<8x256xf32, #tpu.memory_space<vmem>>, vector<8x256xf32>
    %c0_1 = arith.constant 0 : index
    %c0_2 = arith.constant 0 : index
    %1 = vector.load %arg2[%c0_1, %c0_2] : memref<8x256xf32, #tpu.memory_space<vmem>>, vector<8x256xf32>
    tpu.vector_store %arg2[%c0_1, %c0_2], %0 {strides = array<i32>} : memref<8x256xf32, #tpu.memory_space<vmem>>, vector<8x256xf32>,
    return
  }
  func.func @transform_0(%arg0: i32) -> (i32, i32) {
    %c0_i32 = arith.constant 0 : i32
    %c0_i32_0 = arith.constant 0 : i32
    return %arg0, %c0_i32 : i32, i32
  }
  func.func @transform_1(%arg0: i32) -> (i32, i32) {
    %c0_i32 = arith.constant 0 : i32
    %c0_i32_0 = arith.constant 0 : i32
    return %arg0, %c0_i32 : i32, i32
  }
}

</mosaic_0001>

<bundles_post_ra>
// kernel: tpu_custom_call.1
= control target key start
LH: loop header
LB: loop body
LE: loop exit
PB: predicated region body
PF: predicated region fallthrough
CT: control target
= control target key end

     0   :  { %6 = vsyncpa [#allocation3], 0  ;;  %s116_s0 = inlined_call_operand.hbm [shape: f32[8,256], index: 0, kind: input, shape index: {}]   ;;  %s117_s1 = inlined_call_operand.hbm [shape: f32[8,256], index: 1, kind: output, shape index: {}]  }
   0x1   :  { %7 = vsyncpa [#allocation4], 0  ;;  %s13_s8 = sshll.u32 %s116_s0, 4  ;;  %s98_s9 = smov [#allocation2]   ;;  %s14_s8 = int_to_ptr.hbm [resolvable:$true] %s13_s8 }
   0x2   :  { %s15_s10 = sshll.u32 %s98_s9, 4  ;;  %s16_s10 = int_to_ptr.vmem [resolvable:$true] %s15_s10 }
   0x3   :  { %18 = dma.hbm_to_vmem [thread:$0]  %s14_s8, 256, %s16_s10, [#allocation3]  }
   0x4   :  { %94 = dma.done.wait [#allocation3], 256  }
   0x5   :  { %95 = vsyncadd [#allocation3], 4294967040  ;;  %s99_s11 = smov [#allocation5]   ;;  %s34_s15 = sshll.u32 %s117_s1, 4  ;;  %v23_v0 = vld [vmem:[#allocation2] sm:$0xff]  ;;  %v24_v1 = vld [vmem:[#allocation2 + $0x8] sm:$0xff]  ;;  %s35_s15 = int_to_ptr.hbm [resolvable:$true] %s34_s15 }
   0x6   :  { %s32_s12 = sshll.u32 %s99_s11, 4  ;;  %25 = vst [vmem:[#allocation5] sm:$0xff] %v23_v0  ;;  %s33_s12 = int_to_ptr.vmem [resolvable:$true] %s32_s12 }
   0x7   :  { %26 = vst [vmem:[#allocation5 + $0x8] sm:$0xff] %v24_v1 }
   0x8   :  { %37 = dma.vmem_to_hbm [thread:$0]  %s33_s12, 256, %s35_s15, [#allocation4]  }
   0x9   :  { %96 = dma.done.wait [#allocation4], 256  }
   0xa   :  { %97 = vsyncadd [#allocation4], 4294967040 }
   0xb   :  { %42 = vsyncpa [#allocation3], 1 }
   0xc   :  { %43 = vsyncpa [#allocation4], 1 }

</bundles_post_ra>
